<compile_context>
chip_gen: v7x
topology: tpu7x:2x2x1
jax: 0.10.0
libtpu: 0.0.40
codegen_flags: <defaults>
</compile_context>

<pallas_src>
import math

import jax
import jax.numpy as jnp
from jax.experimental import pallas as pl
from jax.experimental.pallas import tpu as pltpu


def _cdiv(a, b):
    return -(-a // b)


# ---------------------------------------------------------------------------
# Path 1: small table -> VMEM-resident, one-hot MXU gather, lane-dense output.
# ---------------------------------------------------------------------------
def _vmem_onehot_kernel(ids_ref, table_ref, out_ref):
    # ids_ref   : (rows_blk, k)      int32, VMEM (k tokens packed per out row)
    # table_ref : (n_V, n_d)         f32,   VMEM (resident: index_map == (0,0))
    # out_ref   : (rows_blk, k*n_d)  f32,   VMEM output block (auto write-back)
    rows_blk, k = ids_ref.shape
    n_V, n_d = table_ref.shape
    tbl = table_ref[...]
    col = jax.lax.broadcasted_iota(jnp.int32, (rows_blk, n_V), 1)
    for j in range(k):                       # static, k = 128 // n_d (small)
        ids_j = ids_ref[:, j:j + 1]          # (rows_blk, 1)
        onehot = (ids_j == col).astype(tbl.dtype)
        emb = jnp.dot(onehot, tbl, preferred_element_type=jnp.float32)
        out_ref[:, j * n_d:(j + 1) * n_d] = emb.astype(out_ref.dtype)


def _embedding_lookup_vmem(ids_flat, table, *, t_blk):
    (num_tok,) = ids_flat.shape
    n_V, n_d = table.shape
    itemsize = jnp.dtype(table.dtype).itemsize

    # Pack k tokens per 128-lane output row when n_d divides 128.
    k = 128 // n_d if (n_d <= 128 and 128 % n_d == 0) else 1

    n_rows = _cdiv(num_tok, k)
    n_rows8 = _cdiv(n_rows, 8) * 8
    rows_blk = min(max(t_blk // k, 8), n_rows8)
    rows_blk = max((rows_blk // 8) * 8, 8)
    padded_rows = _cdiv(n_rows, rows_blk) * rows_blk
    padded_tok = padded_rows * k

    ids_pad = jnp.pad(ids_flat, (0, padded_tok - num_tok)).reshape(padded_rows, k)

    flops = 2 * padded_tok * n_V * n_d
    bytes_accessed = int(n_V * n_d * itemsize          # table read once
                         + padded_tok * 4              # ids
                         + padded_tok * n_d * itemsize)  # output write-back

    out = pl.pallas_call(
        _vmem_onehot_kernel,
        out_shape=jax.ShapeDtypeStruct((padded_rows, k * n_d), table.dtype),
        grid=(padded_rows // rows_blk,),
        in_specs=[
            pl.BlockSpec((rows_blk, k), lambda i: (i, 0)),   # ids block (VMEM)
            pl.BlockSpec((n_V, n_d), lambda i: (0, 0)),      # resident table
        ],
        out_specs=pl.BlockSpec((rows_blk, k * n_d), lambda i: (i, 0)),
        compiler_params=pltpu.CompilerParams(
            dimension_semantics=("parallel",),               # split across TCs
        ),
        cost_estimate=pl.CostEstimate(
            flops=flops, transcendentals=0, bytes_accessed=bytes_accessed),
    )(ids_pad, table)

    # Unpack the lane-dense rows: (padded_rows, k*n_d) -> (padded_rows*k, n_d).
    return out.reshape(padded_rows * k, n_d)[:num_tok]


# ---------------------------------------------------------------------------
# Path 2: large table -> HBM row-gather with per-row async DMAs.
# ---------------------------------------------------------------------------
def _hbm_gather_kernel(ids_hbm, table_hbm, out_ref, ids_smem, ids_sem, row_sem):
    # ids_hbm   : (n_blocks, t_blk) int32, HBM (no auto DMA)
    # table_hbm : (n_V, n_d)        f32,   HBM (no auto DMA)
    # out_ref   : (t_blk, n_d)      f32,   VMEM output block (auto write-back)
    # ids_smem  : (t_blk,)          int32, SMEM scratch
    # ids_sem / row_sem : scalar DMA semaphores
    t_blk = out_ref.shape[0]
    i = pl.program_id(0)

    # Fetch this block's ids into SMEM (only t_blk*4 bytes of SMEM, any batch).
    idcp = pltpu.make_async_copy(ids_hbm.at[i], ids_smem, ids_sem)
    idcp.start()
    idcp.wait()

    # Issue all row DMAs (HBM table row -> VMEM output row).  All SMEM id
    # reads happen here, before the first row-copy wait.  Partial unroll only:
    # DMA descriptors issue at most one per bundle anyway.
    def _start(t, carry):
        row = ids_smem[t]
        pltpu.make_async_copy(table_hbm.at[row], out_ref.at[t], row_sem).start()
        return carry

    jax.lax.fori_loop(0, t_blk, _start, 0, unroll=8)

    # One wait per issued copy.  Every copy moves an identical byte count
    # (one n_d row of one table), so waiting on a same-sized descriptor is
    # exact; no unroll (blocking waits gain nothing from unrolling).
    def _wait(t, carry):
        pltpu.make_async_copy(table_hbm.at[0], out_ref.at[0], row_sem).wait()
        return carry

    jax.lax.fori_loop(0, t_blk, _wait, 0)
    # TODO(synk): optional tail-block guard / pad-id dedup would skip a few
    # redundant row DMAs in the final block; negligible for realistic shapes.


def _embedding_lookup_hbm(ids_flat, table, *, t_blk):
    (num_tok,) = ids_flat.shape
    n_V, n_d = table.shape
    itemsize = jnp.dtype(table.dtype).itemsize

    t_blk = max((min(t_blk, _cdiv(num_tok, 8) * 8) // 8) * 8, 8)
    padded_tok = _cdiv(num_tok, t_blk) * t_blk
    n_blocks = padded_tok // t_blk

    ids_pad = jnp.pad(ids_flat, (0, padded_tok - num_tok)).reshape(n_blocks, t_blk)

    bytes_accessed = int(2 * padded_tok * n_d * itemsize + padded_tok * 4)

    out = pl.pallas_call(
        _hbm_gather_kernel,
        out_shape=jax.ShapeDtypeStruct((padded_tok, n_d), table.dtype),
        grid=(n_blocks,),
        in_specs=[
            pl.BlockSpec(memory_space=pl.ANY),   # ids stay in HBM, chunked->SMEM
            pl.BlockSpec(memory_space=pl.ANY),   # table stays in HBM
        ],
        out_specs=pl.BlockSpec((t_blk, n_d), lambda i: (i, 0)),
        scratch_shapes=[
            pltpu.SMEM((t_blk,), jnp.int32),
            pltpu.SemaphoreType.DMA(()),
            pltpu.SemaphoreType.DMA(()),
        ],
        compiler_params=pltpu.CompilerParams(
            dimension_semantics=("parallel",),
        ),
        cost_estimate=pl.CostEstimate(
            flops=0, transcendentals=0, bytes_accessed=bytes_accessed),
    )(ids_pad, table)

    return out[:num_tok]


# ---------------------------------------------------------------------------
# Public wrapper (== EmbeddingLayer.forward) and weight construction (== init).
# ---------------------------------------------------------------------------
def embedding_lookup(ids, table, *, t_blk=512, force_hbm=False):
    """Equivalent of `nn.Embedding(n_V, n_d)(ids)` with a (n_V, n_d) weight."""
    orig_shape = ids.shape
    n_V, n_d = table.shape
    num_tok = math.prod(orig_shape)

    # ids are addressing data: flat int32.  NOTE: out-of-range ids are clamped
    # (nn.Embedding would raise) so a bad id can never drive an OOB read/DMA.
    ids_flat = jnp.clip(ids.reshape(num_tok).astype(jnp.int32), 0, n_V - 1)

    table_bytes = n_V * n_d * jnp.dtype(table.dtype).itemsize
    use_vmem = (not force_hbm) and n_V <= 2048 and table_bytes <= 4 * 1024 * 1024

    if use_vmem:
        out = _embedding_lookup_vmem(ids_flat, table, t_blk=t_blk)
    else:
        out = _embedding_lookup_hbm(ids_flat, table, t_blk=t_blk)

    return out.reshape(*orig_shape, n_d)


def make_embedding_weight(embs, normalize=True):
    """Mimics EmbeddingLayer.__init__: copy `embs`, then L2-normalize each row."""
    weight = jnp.asarray(embs, dtype=jnp.float32)
    if normalize:
        norms = jnp.sqrt(jnp.sum(weight * weight, axis=1, keepdims=True))
        norms = jnp.maximum(norms, 1e-12)   # guard all-zero rows (NaN in torch)
        weight = weight / norms
    return weight


if __name__ == "__main__":
    key = jax.random.PRNGKey(0)
    k_emb, k_ids = jax.random.split(key)

    # Module hyper-params (small, consistent with the module's __init__):
    n_d = 32
    vocab = {f"w{i}": i for i in range(30)}
    oov, pad = "<unk>", "<pad>"
    if oov not in vocab:
        vocab[oov] = len(vocab)
    if pad not in vocab:
        vocab[pad] = len(vocab)
    n_V = len(vocab)                      # 32 (incl. <unk>, <pad>)

    # Deterministic synthetic `embs` (stands in for the numpy array copied in).
    embs = jax.random.uniform(
        k_emb, (n_V, n_d), minval=-0.25, maxval=0.25, dtype=jnp.float32)
    weight = make_embedding_weight(embs, normalize=True)

    # Forward: a batch of token-id sequences.
    B, T = 2, 8
    ids = jax.random.randint(k_ids, (B, T), 0, n_V, dtype=jnp.int32)
    ref = jnp.take(weight, ids, axis=0)

    # Fast path (natural choice for this table size): VMEM-resident table,
    # one-hot MXU gather, lane-dense packed output.
    out_vmem = jax.block_until_ready(embedding_lookup(ids, weight))
    assert out_vmem.shape == (B, T, n_d) and out_vmem.dtype == jnp.float32
    assert jnp.allclose(out_vmem, ref, atol=1e-5), "VMEM path mismatch"

    # Large-vocab path, forced here at tiny size to verify it end-to-end:
    # HBM row-gather DMAs with per-block SMEM ids.
    out_hbm = jax.block_until_ready(
        embedding_lookup(ids, weight, t_blk=8, force_hbm=True))
    assert out_hbm.shape == (B, T, n_d) and out_hbm.dtype == jnp.float32
    assert jnp.allclose(out_hbm, ref, atol=1e-6), "HBM path mismatch"

    # TODO(synk): fix_emb (requires_grad=False) is a training-time flag with no
    # forward-pass equivalent; nothing to implement in the kernel.
    print("KERNEL_OK")
</pallas_src>

<mosaic_0001>
module attributes {stable_mosaic.version = 11 : i64} {
  func.func @_vmem_onehot_kernel(%arg0: i32, %arg1: memref<8x4xi32, #tpu.memory_space<vmem>>, %arg2: memref<32x32xf32, #tpu.memory_space<vmem>>, %arg3: memref<8x128xf32, #tpu.memory_space<vmem>>) attributes {dimension_semantics = [#tpu.dimension_semantics<parallel>], iteration_bounds = array<i64: 1>, scalar_prefetch = 0 : i64, scratch_operands = 0 : i64, tpu.core_type = #tpu.core_type<tc>, window_params = [{transform_indices = @transform_0, window_bounds = array<i64: 8, 4>}, {pipeline_mode = #tpu.pipeline_mode<synchronous>, transform_indices = @transform_1, window_bounds = array<i64: 32, 32>}, {transform_indices = @transform_2, window_bounds = array<i64: 8, 128>}]} {
    %c0 = arith.constant 0 : index
    %c0_0 = arith.constant 0 : index
    %0 = vector.load %arg2[%c0, %c0_0] : memref<32x32xf32, #tpu.memory_space<vmem>>, vector<32x32xf32>
    %1 = tpu.iota {dimensions = array<i32: 1>} : vector<8x32xi32>
    %c0_1 = arith.constant 0 : index
    %c0_2 = arith.constant 0 : index
    %2 = vector.load %arg1[%c0_1, %c0_2] : memref<8x4xi32, #tpu.memory_space<vmem>>, vector<8x1xi32>
    %3 = vector.broadcast %2 : vector<8x1xi32> to vector<8x32xi32>
    %4 = arith.cmpi eq, %3, %1 : vector<8x32xi32>
    %5 = arith.extui %4 : vector<8x32xi1> to vector<8x32xi32>
    %6 = arith.sitofp %5 : vector<8x32xi32> to vector<8x32xf32>
    %cst = arith.constant dense<0.000000e+00> : vector<8x32xf32>
    %7 = tpu.matmul %6, %0, %cst {dimension_numbers = #tpu.dot_dimension_numbers<[1], [0], [0], [1], [0, 0, 1, 1], [], []>} : vector<8x32xf32>, vector<32x32xf32>, vector<8x32xf32> -> vector<8x32xf32>
    %c0_3 = arith.constant 0 : index
    %c0_4 = arith.constant 0 : index
    %8 = vector.load %arg3[%c0_3, %c0_4] : memref<8x128xf32, #tpu.memory_space<vmem>>, vector<8x32xf32>
    tpu.vector_store %arg3[%c0_3, %c0_4], %7 {strides = array<i32>} : memref<8x128xf32, #tpu.memory_space<vmem>>, vector<8x32xf32>,
    %c0_5 = arith.constant 0 : index
    %c1 = arith.constant 1 : index
    %9 = vector.load %arg1[%c0_5, %c1] : memref<8x4xi32, #tpu.memory_space<vmem>>, vector<8x1xi32>
    %10 = vector.broadcast %9 : vector<8x1xi32> to vector<8x32xi32>
    %11 = arith.cmpi eq, %10, %1 : vector<8x32xi32>
    %12 = arith.extui %11 : vector<8x32xi1> to vector<8x32xi32>
    %13 = arith.sitofp %12 : vector<8x32xi32> to vector<8x32xf32>
    %cst_6 = arith.constant dense<0.000000e+00> : vector<8x32xf32>
    %14 = tpu.matmul %13, %0, %cst_6 {dimension_numbers = #tpu.dot_dimension_numbers<[1], [0], [0], [1], [0, 0, 1, 1], [], []>} : vector<8x32xf32>, vector<32x32xf32>, vector<8x32xf32> -> vector<8x32xf32>
    %c0_7 = arith.constant 0 : index
    %c32 = arith.constant 32 : index
    %15 = vector.load %arg3[%c0_7, %c32] : memref<8x128xf32, #tpu.memory_space<vmem>>, vector<8x32xf32>
    tpu.vector_store %arg3[%c0_7, %c32], %14 {strides = array<i32>} : memref<8x128xf32, #tpu.memory_space<vmem>>, vector<8x32xf32>,
    %c0_8 = arith.constant 0 : index
    %c2 = arith.constant 2 : index
    %16 = vector.load %arg1[%c0_8, %c2] : memref<8x4xi32, #tpu.memory_space<vmem>>, vector<8x1xi32>
    %17 = vector.broadcast %16 : vector<8x1xi32> to vector<8x32xi32>
    %18 = arith.cmpi eq, %17, %1 : vector<8x32xi32>
    %19 = arith.extui %18 : vector<8x32xi1> to vector<8x32xi32>
    %20 = arith.sitofp %19 : vector<8x32xi32> to vector<8x32xf32>
    %cst_9 = arith.constant dense<0.000000e+00> : vector<8x32xf32>
    %21 = tpu.matmul %20, %0, %cst_9 {dimension_numbers = #tpu.dot_dimension_numbers<[1], [0], [0], [1], [0, 0, 1, 1], [], []>} : vector<8x32xf32>, vector<32x32xf32>, vector<8x32xf32> -> vector<8x32xf32>
    %c0_10 = arith.constant 0 : index
    %c64 = arith.constant 64 : index
    %22 = vector.load %arg3[%c0_10, %c64] : memref<8x128xf32, #tpu.memory_space<vmem>>, vector<8x32xf32>
    tpu.vector_store %arg3[%c0_10, %c64], %21 {strides = array<i32>} : memref<8x128xf32, #tpu.memory_space<vmem>>, vector<8x32xf32>,
    %c0_11 = arith.constant 0 : index
    %c3 = arith.constant 3 : index
    %23 = vector.load %arg1[%c0_11, %c3] : memref<8x4xi32, #tpu.memory_space<vmem>>, vector<8x1xi32>
    %24 = vector.broadcast %23 : vector<8x1xi32> to vector<8x32xi32>
    %25 = arith.cmpi eq, %24, %1 : vector<8x32xi32>
    %26 = arith.extui %25 : vector<8x32xi1> to vector<8x32xi32>
    %27 = arith.sitofp %26 : vector<8x32xi32> to vector<8x32xf32>
    %cst_12 = arith.constant dense<0.000000e+00> : vector<8x32xf32>
    %28 = tpu.matmul %27, %0, %cst_12 {dimension_numbers = #tpu.dot_dimension_numbers<[1], [0], [0], [1], [0, 0, 1, 1], [], []>} : vector<8x32xf32>, vector<32x32xf32>, vector<8x32xf32> -> vector<8x32xf32>
    %c0_13 = arith.constant 0 : index
    %c96 = arith.constant 96 : index
    %29 = vector.load %arg3[%c0_13, %c96] : memref<8x128xf32, #tpu.memory_space<vmem>>, vector<8x32xf32>
    tpu.vector_store %arg3[%c0_13, %c96], %28 {strides = array<i32>} : memref<8x128xf32, #tpu.memory_space<vmem>>, vector<8x32xf32>,
    return
  }
  func.func @transform_0(%arg0: i32) -> (i32, i32) {
    %c0_i32 = arith.constant 0 : i32
    %c0_i32_0 = arith.constant 0 : i32
    return %arg0, %c0_i32 : i32, i32
  }
  func.func @transform_1(%arg0: i32) -> (i32, i32) {
    %c0_i32 = arith.constant 0 : i32
    %c0_i32_0 = arith.constant 0 : i32
    %c0_i32_1 = arith.constant 0 : i32
    return %c0_i32, %c0_i32_0 : i32, i32
  }
  func.func @transform_2(%arg0: i32) -> (i32, i32) {
    %c0_i32 = arith.constant 0 : i32
    %c0_i32_0 = arith.constant 0 : i32
    return %arg0, %c0_i32 : i32, i32
  }
}

</mosaic_0001>

<bundles_post_ra>
// kernel: tpu_custom_call.1
= control target key start
LH: loop header
LB: loop body
LE: loop exit
PB: predicated region body
PF: predicated region fallthrough
CT: control target
= control target key end

     0   :  { %7 = vsyncpa [#allocation3], 0  ;;  %s615_s0 = inlined_call_operand.vmem [shape: s32[8,4], index: 0, kind: input, shape index: {}]   ;;  %s616_s1 = inlined_call_operand.hbm [shape: f32[32,32], index: 1, kind: input, shape index: {}]   ;;  %s617_s2 = inlined_call_operand.hbm [shape: f32[8,128], index: 2, kind: output, shape index: {}]  }
   0x1   :  { %8 = vsyncpa [#allocation4], 0  ;;  %s550_s9 = smov [#allocation2]   ;;  %s502_s13 = scalar_lea.hbm %s616_s1, 512 }
   0x2   :  { %s16_s10 = sshll.u32 %s550_s9, 4  ;;  %p503_p0 = scmp.ne.s32.totalorder %s616_s1, %s502_s13  ;;  %s17_s10 = int_to_ptr.vmem [resolvable:$true] %s16_s10 }
   0x3   :  { %p506_p1 = scmp.lt.u32.totalorder %s502_s13, %s616_s1 }
   0x5   :  { %p508_p2 = pnand %p506_p1, %p503_p0 }
   0x7   :  { %511 = shalt.err (!%p508_p2)
}
   0x8   :  { %s512_s18 = scalar_lea.vmem %s17_s10, 512  ;;  %p517_p4 = scmp.lt.s32.totalorder %s17_s10, %s17_s10 }
   0x9   :  { %p513_p3 = scmp.ne.s32.totalorder %s17_s10, %s512_s18  ;;  %p518_p5 = scmp.lt.s32.totalorder %s512_s18, %s512_s18 }
   0xb   :  { %p519_p6 = por %p518_p5, %p517_p4 }
   0xd   :  { %p520_p7 = pnand %p519_p6, %p513_p3 }
   0xf   :  { %523 = shalt.err (!%p520_p7)
}
  0x10   :  { %s551_s19 = smov 128   ;;  %s552_s20 = smov 8  }
  0x11   :  { %22 = dma.hbm_to_vmem [thread:$0]  %s616_s1, 512, %s17_s10, [#allocation3], %s551_s19, %s551_s19, %s552_s20  }
  0x12   :  { %546 = dma.done.wait [#allocation3], 512  }
  0x13   :  { %547 = vsyncadd [#allocation3], 4294966784  ;;  %v553_v0 = vmov 0   ;;  %v554_v1 = vmov 2   ;;  %v555_v2 = vmov 0.0|0.0   ;;  %v32_v3 = vld [vmem:[%s615_s0] sm:$0xff]  ;;  %v30_v13 = vlaneseq }
  0x14   :  { %497 = vset.pattern.permute.xlu0 %v553_v0  ;;  %499 = vset.pattern.permute.xlu1 %v554_v1  ;;  %v26_v4 = vld [vmem:[#allocation2] sm:$0xff]  ;;  %v27_v5 = vld [vmem:[#allocation2 + $0x8] sm:$0xff]  ;;  %v28_v7 = vld [vmem:[#allocation2 + $0x10] sm:$0xff]  ;;  %vm556_vm0 = vmmov 0   ;;  %v557_v9 = vmov 0.0   ;;  %v558_v11 = vmov 1  }
  0x15   :  { %459 = vmatprep.subr.bf16.mxu0 %v555_v2  ;;  %465 = vmatprep.subr.bf16.mxu1 %v555_v2  ;;  %v460_v6 = vpack.c.bf16 %v27_v5, %v26_v4  ;;  %v29_v8 = vld [vmem:[#allocation2 + $0x18] sm:$0xff]  ;;  %v559_v12 = vmov 3   ;;  %v31_v14 = vand.u32 127, %v30_v13  ;;  %vm39_vm1 = vcmask 261120   ;;  %s560_s0 = smov 32   ;;  %s561_s1 = smov 64  }
  0x16   :  { %34 = vperm.xlu0 %497, %v32_v3   ;;  %202 = vperm.xlu1 %499, %v32_v3   ;;  %v463_v10 = vpack.c.bf16 %v29_v8, %v28_v7  ;;  %s562_s25 = smov 96   ;;  %vm198_vm6 = vcmask 523520   ;;  %vm284_vm7 = vcmask 785920   ;;  %s563_s26 = smov [#allocation5]   ;;  %vm370_vm8 = vcmask 1048320  }
  0x17   :  { %423 = vmatprep.mubr.msk.f32.mxu0 %vm556_vm0, %v557_v9  ;;  %434 = vmatprep.mubr.msk.f32.mxu1 %vm556_vm0, %v557_v9  ;;  %s378_s27 = sshll.u32 %s563_s26, 4  ;;  %s379_s27 = int_to_ptr.vmem [resolvable:$true] %s378_s27 }
  0x18   :  { %461 = vmatpush3.bf16.msra.mxu0 %v460_v6  ;;  %467 = vmatpush3.bf16.msra.mxu1 %v460_v6  ;;  %s524_s28 = scalar_lea.vmem %s379_s27, 128  ;;  %p529_p9 = scmp.lt.s32.totalorder %s379_s27, %s379_s27 }
  0x19   :  { %462 = vmatprep.subr.bf16.mxu0 %v555_v2  ;;  %468 = vmatprep.subr.bf16.mxu1 %v555_v2  ;;  %p525_p8 = scmp.ne.s32.totalorder %s379_s27, %s524_s28  ;;  %p530_p10 = scmp.lt.s32.totalorder %s524_s28, %s524_s28 }
  0x1a   :  { %498 = vset.pattern.permute.xlu0 %v558_v11  ;;  %500 = vset.pattern.permute.xlu1 %v559_v12 }
  0x1b   :  { %116 = vperm.xlu0 %498, %v32_v3   ;;  %288 = vperm.xlu1 %500, %v32_v3   ;;  %p531_p11 = por %p530_p10, %p529_p9 }
  0x1c   :  { %464 = vmatpush3.bf16.msra.mxu0 %v463_v10  ;;  %470 = vmatpush3.bf16.msra.mxu1 %v463_v10 }
  0x1d   :  { %471 = vmatprep.subr.bf16.mxu0 %v555_v2  ;;  %477 = vmatprep.subr.bf16.mxu1 %v555_v2  ;;  %p532_p12 = pnand %p531_p11, %p525_p8 }
  0x1f   :  { %501 = vset.pattern.permute.xlu0 %v559_v12 }
  0x95   :  { %v35_v15 = vpop.permute.xlu0 %34  ;;  %v203_v16 = vpop.permute.xlu1 %202 }
  0x96   :  { %vm36_vm2 = vcmp.eq.s32.totalorder %v35_v15, %v31_v14  ;;  %vm204_vm3 = vcmp.eq.s32.totalorder %v203_v16, %v31_v14 }
  0x97   :  { %v387_v17 = vsel %vm36_vm2, 1.0, %v557_v9  ;;  %v391_v21 = vsel %vm204_vm3, 1.0, %v557_v9 }
  0x98   :  { %424 = vmatmul.mubr.msk.f32.vlgmr.msra.gmra.mrb[0].mxu0 %vm39_vm1, %v387_v17 }
  0x99   :  { %473 = vmatpush3.bf16.msra.mxu0 %v460_v6  ;;  %445 = vmatprep.mubr.msk.f32.mxu0 %vm556_vm0, %v557_v9 }
  0x9a   :  { %v117_v18 = vpop.permute.xlu0 %116  ;;  %474 = vmatprep.subr.bf16.mxu0 %v555_v2  ;;  %v289_v20 = vpop.permute.xlu1 %288 }
  0x9b   :  { %vm118_vm4 = vcmp.eq.s32.totalorder %v117_v18, %v31_v14  ;;  %vm290_vm5 = vcmp.eq.s32.totalorder %v289_v20, %v31_v14 }
  0x9c   :  { %v389_v19 = vsel %vm118_vm4, 1.0, %v557_v9  ;;  %v393_v22 = vsel %vm290_vm5, 1.0, %v557_v9 }
  0x9d   :  { %476 = vmatpush3.bf16.msra.mxu0 %v463_v10  ;;  %435 = vmatmul.mubr.msk.f32.vlgmr.msra.gmra.mrb[0].mxu1 %vm39_vm1, %v389_v19 }
  0x9e   :  { %479 = vmatpush3.bf16.msra.mxu1 %v460_v6  ;;  %456 = vmatprep.mubr.msk.f32.mxu1 %vm556_vm0, %v557_v9 }
  0x9f   :  { %480 = vmatprep.subr.bf16.mxu1 %v555_v2 }
  0xa0   :  { %446 = vmatmul.mubr.msk.f32.vlgmr.msra.gmra.mrb[2].mxu0 %vm39_vm1, %v391_v21 }
  0xa2   :  { %482 = vmatpush3.bf16.msra.mxu1 %v463_v10 }
  0xa5   :  { %457 = vmatmul.mubr.msk.f32.vlgmr.msra.gmra.mrb[2].mxu1 %vm39_vm1, %v393_v22 }
 0x16b   :  { %v109_v23 = vpop.f32.mrb[0].mxu0 }
 0x16c   :  { %113 = vst.msk [vmem:[#allocation5] sm:$0xff] %vm39_vm1, %v109_v23  ;;  %v425_v24 = vpop.f32.mrb[1].mxu0 }
 0x170   :  { %v190_v25 = vpop.f32.mrb[0].mxu1 }
 0x171   :  { %195 = vrot.lane.b32.xlu1 %v190_v25, %s560_s0  ;;  %v436_v26 = vpop.f32.mrb[1].mxu1 }
 0x173   :  { %v276_v27 = vpop.f32.mrb[2].mxu0 }
 0x174   :  { %281 = vrot.lane.b32.xlu0 %v276_v27, %s561_s1  ;;  %v447_v28 = vpop.f32.mrb[3].mxu0 }
 0x178   :  { %v362_v29 = vpop.f32.mrb[2].mxu1 }
 0x179   :  { %367 = vrot.lane.b32.xlu1 %v362_v29, %s562_s25  ;;  %v458_v30 = vpop.f32.mrb[3].mxu1 }
 0x1e3   :  { %v196_v31 = vpop.permute.xlu1 %195 }
 0x1e4   :  { %199 = vst.msk [vmem:[#allocation5] sm:$0xff] %vm198_vm6, %v196_v31 }
 0x1e6   :  { %v282_v32 = vpop.permute.xlu0 %281 }
 0x1e7   :  { %285 = vst.msk [vmem:[#allocation5] sm:$0xff] %vm284_vm7, %v282_v32 }
 0x1eb   :  { %v368_v33 = vpop.permute.xlu1 %367 }
 0x1ec   :  { %371 = vst.msk [vmem:[#allocation5] sm:$0xff] %vm370_vm8, %v368_v33 }
 0x1ed   :  { %535 = shalt.err (!%p532_p12)
}
 0x1ee   :  { %s536_s3 = scalar_lea.hbm %s617_s2, 128 }
 0x1ef   :  { %p537_p13 = scmp.ne.s32.totalorder %s617_s2, %s536_s3  ;;  %p540_p0 = scmp.lt.u32.totalorder %s536_s3, %s617_s2 }
 0x1f1   :  { %p542_p1 = pnand %p540_p0, %p537_p13 }
 0x1f3   :  { %545 = shalt.err (!%p542_p1)
}
 0x1f4   :  { %381 = dma.vmem_to_hbm [thread:$0]  %s379_s27, 128, %s617_s2, [#allocation4]  }
 0x1f5   :  { %548 = dma.done.wait [#allocation4], 128  }
 0x1f6   :  { %549 = vsyncadd [#allocation4], 4294967168 }
 0x1f7   :  { %385 = vsyncpa [#allocation3], 1 }
 0x1f8   :  { %386 = vsyncpa [#allocation4], 1 }

</bundles_post_ra>
